<compile_context>
chip_gen: v5e
topology: v5e:2x2
jax: 0.10.0
libtpu: 0.0.40
codegen_flags: <defaults>
</compile_context>

<pallas_src>
import jax
import jax.numpy as jnp
from jax.experimental import pallas as pl
from jax.experimental.pallas import tpu as pltpu


# ----------------------------- helpers --------------------------------------

_SMALL_BYTES = 512 * 1024      # below this total operand size: single VMEM block
_MAX_TILE_MN = 512             # big output tiles -> high FLOP/byte (v5e/v6e)
_MAX_TILE_K = 512


def _round_up(x: int, m: int) -> int:
    return (x + m - 1) // m * m


def _pick_tile(dim: int, align: int, max_tile: int) -> int:
    """Largest tile (multiple of `align`, <= max_tile) that divides `dim`;
    otherwise the tile that minimizes padding (ties -> larger tile)."""
    top = max(align, (max_tile // align) * align)
    t = top
    while t >= align:
        if dim % t == 0:
            return t
        t -= align
    best_t, best_pad = align, _round_up(dim, align)
    t = top
    while t >= align:
        p = _round_up(dim, t)
        if p < best_pad or (p == best_pad and t > best_t):
            best_pad, best_t = p, t
        t -= align
    return best_t


# ----------------------------- kernels ---------------------------------------

def _small_mm_bias_kernel(x1_ref, x2_ref, bias_ref, o_ref):
    # Whole problem in one VMEM block: one MXU matmul + VPU add.
    o_ref[...] = (
        jnp.dot(x1_ref[...], x2_ref[...], preferred_element_type=jnp.float32)
        + bias_ref[...]
    ).astype(o_ref.dtype)


def _mm_bias_kernel_f32(x1_ref, x2_ref, bias_ref, o_ref):
    # f32 output: the output block is resident across the K axis, so use it as
    # the accumulator directly (no scratch, no epilogue copy+add).
    @pl.when(pl.program_id(2) == 0)
    def _():
        o_ref[...] = bias_ref[...]

    o_ref[...] += jnp.dot(
        x1_ref[...], x2_ref[...], preferred_element_type=jnp.float32
    )


def _mm_bias_kernel_acc(x1_ref, x2_ref, bias_ref, o_ref, acc_ref):
    # Narrow output dtype: accumulate in an f32 scratch, cast once at the end.
    k = pl.program_id(2)

    @pl.when(k == 0)
    def _():
        acc_ref[...] = bias_ref[...].astype(jnp.float32)

    acc_ref[...] += jnp.dot(
        x1_ref[...], x2_ref[...], preferred_element_type=jnp.float32
    )

    @pl.when(k == pl.num_programs(2) - 1)
    def _():
        o_ref[...] = acc_ref[...].astype(o_ref.dtype)


# ----------------------------- wrappers --------------------------------------

def _small_mm_bias(x1, x2, bias):
    M, _ = x1.shape
    _, N = x2.shape
    return pl.pallas_call(
        _small_mm_bias_kernel,
        out_shape=jax.ShapeDtypeStruct((M, N), x1.dtype),
    )(x1, x2, bias)


def _tiled_mm_bias(x1, x2, bias):
    M, K = x1.shape
    _, N = x2.shape
    f32_out = x1.dtype == jnp.float32

    # Shape-aware tiles: prefer exact divisors, cap at 512 for intensity.
    tm = _pick_tile(M, 8, _MAX_TILE_MN)
    tn = _pick_tile(N, 128, _MAX_TILE_MN)
    tk = _pick_tile(K, 128, _MAX_TILE_K)
    Mp, Kp, Np = _round_up(M, tm), _round_up(K, tk), _round_up(N, tn)

    # v7x has 2 TensorCores sharded over the parallel axes: make sure the
    # (i, j) grid has >= 2 blocks when possible (harmless on v5e/v6e).
    while ((Mp // tm) * (Np // tn) < 2 and tm >= 256 and tm % 2 == 0
           and Mp % (tm // 2) == 0 and (tm // 2) % 8 == 0):
        tm //= 2

    # Pad only when a dimension is not an exact multiple of its tile.
    if (Mp, Kp) != (M, K):
        x1 = jnp.pad(x1, ((0, Mp - M), (0, Kp - K)))
    if (Kp, Np) != (K, N):
        x2 = jnp.pad(x2, ((0, Kp - K), (0, Np - N)))
    if (Mp, Np) != (M, N):
        bias = jnp.pad(bias, ((0, Mp - M), (0, Np - N)))

    grid = (Mp // tm, Np // tn, Kp // tk)
    kernel = _mm_bias_kernel_f32 if f32_out else _mm_bias_kernel_acc
    scratch = [] if f32_out else [pltpu.VMEM((tm, tn), jnp.float32)]

    # Explicit VMEM budget (v7x physical VMEM is only 64 MiB).
    step_bytes = 4 * (tm * tk + tk * tn + 2 * tm * tn)
    vmem_limit = int(min(64 * 1024 * 1024, max(32 * 1024 * 1024, 3 * step_bytes)))

    out_p = pl.pallas_call(
        kernel,
        out_shape=jax.ShapeDtypeStruct((Mp, Np), x1.dtype),
        grid_spec=pltpu.PrefetchScalarGridSpec(
            num_scalar_prefetch=0,
            grid=grid,
            in_specs=[
                pl.BlockSpec((tm, tk), lambda i, j, k: (i, k)),
                pl.BlockSpec((tk, tn), lambda i, j, k: (k, j)),
                pl.BlockSpec((tm, tn), lambda i, j, k: (i, j)),  # k-invariant
            ],
            out_specs=pl.BlockSpec((tm, tn), lambda i, j, k: (i, j)),
            scratch_shapes=scratch,
        ),
        compiler_params=pltpu.CompilerParams(
            dimension_semantics=("parallel", "parallel", "arbitrary"),
            vmem_limit_bytes=vmem_limit,
        ),
        cost_estimate=pl.CostEstimate(
            flops=2 * M * N * K,
            bytes_accessed=4 * (Mp * Kp + Kp * Np + 2 * Mp * Np),
            transcendentals=0,
        ),
    )(x1, x2, bias)

    if (Mp, Np) != (M, N):
        out_p = out_p[:M, :N]
    return out_p


def _fused_mm_bias(x1, x2, bias):
    """out = x1 @ x2 + bias with a shape-aware dispatch."""
    M, K = x1.shape
    K2, N = x2.shape
    assert K == K2 and bias.shape == (M, N)
    total_bytes = (M * K + K * N + 2 * M * N) * jnp.dtype(x1.dtype).itemsize
    if total_bytes <= _SMALL_BYTES:
        return _small_mm_bias(x1, x2, bias)
    return _tiled_mm_bias(x1, x2, bias)


def make_model(inp1, inp2):
    """Equivalent of Model: bias = inp1.T + inp2 is folded ONCE at setup time."""
    bias = jnp.asarray(inp1).T + jnp.asarray(inp2)

    @jax.jit
    def forward(x1, x2):
        # torch: mm(x1, x2) + inp1.t() + inp2
        return _fused_mm_bias(x1, x2, bias)

    return forward


# ----------------------------- self-test --------------------------------------

if __name__ == "__main__":
    key = jax.random.PRNGKey(0)
    k1, k2, k3, k4 = jax.random.split(key, 4)

    # --- Module-literal shapes: everything (3, 3) float32 (small fast path) --
    x1 = jax.random.normal(k1, (3, 3), dtype=jnp.float32)
    x2 = jax.random.normal(k2, (3, 3), dtype=jnp.float32)
    inp1 = jax.random.normal(k3, (3, 3), dtype=jnp.float32)  # self.inp1
    inp2 = jax.random.normal(k4, (3, 3), dtype=jnp.float32)  # self.inp2

    forward = make_model(inp1, inp2)
    out = forward(x1, x2)
    jax.block_until_ready(out)
    ref = x1 @ x2 + inp1.T + inp2
    assert out.shape == (3, 3)
    assert jnp.allclose(out, ref, atol=1e-5, rtol=1e-5), "mismatch vs reference (3x3)"

    # --- Larger shapes: exercise the tiled, K-accumulating grid --------------
    M, K, N = 384, 512, 256
    k5, k6, k7, k8 = jax.random.split(jax.random.PRNGKey(1), 4)
    a = jax.random.normal(k5, (M, K), dtype=jnp.float32)
    b = jax.random.normal(k6, (K, N), dtype=jnp.float32)
    p1 = jax.random.normal(k7, (N, M), dtype=jnp.float32)   # inp1 (transposed in fwd)
    p2 = jax.random.normal(k8, (M, N), dtype=jnp.float32)   # inp2

    forward_big = make_model(p1, p2)
    out2 = forward_big(a, b)
    jax.block_until_ready(out2)
    ref2 = a @ b + p1.T + p2
    assert jnp.allclose(out2, ref2, atol=1e-4, rtol=1e-4), "mismatch vs reference (large)"

    print("KERNEL_OK")
</pallas_src>

<mosaic_0001>
module attributes {stable_mosaic.version = 11 : i64} {
  func.func @_small_mm_bias_kernel(%arg0: memref<3x3xf32, #tpu.memory_space<vmem>>, %arg1: memref<3x3xf32, #tpu.memory_space<vmem>>, %arg2: memref<3x3xf32, #tpu.memory_space<vmem>>, %arg3: memref<3x3xf32, #tpu.memory_space<vmem>>) attributes {dimension_semantics = [], scalar_prefetch = 0 : i64, scratch_operands = 0 : i64, tpu.core_type = #tpu.core_type<tc>} {
    %c0 = arith.constant 0 : index
    %c0_0 = arith.constant 0 : index
    %0 = vector.load %arg0[%c0, %c0_0] : memref<3x3xf32, #tpu.memory_space<vmem>>, vector<3x3xf32>
    %c0_1 = arith.constant 0 : index
    %c0_2 = arith.constant 0 : index
    %1 = vector.load %arg1[%c0_1, %c0_2] : memref<3x3xf32, #tpu.memory_space<vmem>>, vector<3x3xf32>
    %cst = arith.constant dense<0.000000e+00> : vector<3x3xf32>
    %2 = tpu.matmul %0, %1, %cst {dimension_numbers = #tpu.dot_dimension_numbers<[1], [0], [0], [1], [0, 0, 1, 1], [], []>} : vector<3x3xf32>, vector<3x3xf32>, vector<3x3xf32> -> vector<3x3xf32>
    %c0_3 = arith.constant 0 : index
    %c0_4 = arith.constant 0 : index
    %3 = vector.load %arg2[%c0_3, %c0_4] : memref<3x3xf32, #tpu.memory_space<vmem>>, vector<3x3xf32>
    %4 = arith.addf %2, %3 : vector<3x3xf32>
    %c0_5 = arith.constant 0 : index
    %c0_6 = arith.constant 0 : index
    %5 = vector.load %arg3[%c0_5, %c0_6] : memref<3x3xf32, #tpu.memory_space<vmem>>, vector<3x3xf32>
    tpu.vector_store %arg3[%c0_5, %c0_6], %4 {strides = array<i32>} : memref<3x3xf32, #tpu.memory_space<vmem>>, vector<3x3xf32>,
    return
  }
}

</mosaic_0001>

<bundles_post_ra>
// kernel: forward.1
= control target key start
LH: loop header
LB: loop body
LE: loop exit
PB: predicated region body
PF: predicated region fallthrough
CT: control target
= control target key end

     0   :  { %8 = vsyncpa [#allocation3], 0  ;;  %s251_s0 = inlined_call_operand.hbm [shape: f32[3,3], index: 0, kind: input, shape index: {}]   ;;  %s252_s1 = inlined_call_operand.hbm [shape: f32[3,3], index: 1, kind: input, shape index: {}]   ;;  %s253_s2 = inlined_call_operand.hbm [shape: f32[3,3], index: 2, kind: input, shape index: {}]   ;;  %s254_s3 = inlined_call_operand.hbm [shape: f32[3,3], index: 3, kind: output, shape index: {}]  }
   0x1   :  { %9 = vsyncpa [#allocation6], 0  ;;  %s27_s14 = sshll.u32 %s252_s1, 4  ;;  %s28_s14 = int_to_ptr.hbm [resolvable:$true] %s27_s14 }
   0x2   :  { %10 = vsyncpa [#allocation4], 0  ;;  %s215_s15 = smov [#allocation5]   ;;  %s16_s19 = sshll.u32 %s251_s0, 4  ;;  %s17_s19 = int_to_ptr.hbm [resolvable:$true] %s16_s19 }
   0x3   :  { %s29_s16 = sshll.u32 %s215_s15, 4  ;;  %s216_s20 = smov [#allocation2]   ;;  %s30_s16 = int_to_ptr.vmem [resolvable:$true] %s29_s16 }
   0x4   :  { %32 = dma.hbm_to_vmem [thread:$0]  %s28_s14, 64, %s30_s16, [#allocation6]  }
   0x5   :  { %s18_s21 = sshll.u32 %s216_s20, 4  ;;  %s38_s24 = sshll.u32 %s253_s2, 4  ;;  %s19_s21 = int_to_ptr.vmem [resolvable:$true] %s18_s21  ;;  %s39_s24 = int_to_ptr.hbm [resolvable:$true] %s38_s24 }
   0x6   :  { %21 = dma.hbm_to_vmem [thread:$0]  %s17_s19, 64, %s19_s21, [#allocation3]  }
   0x7   :  { %s217_s1 = smov [#allocation7]  }
   0x8   :  { %s40_s25 = sshll.u32 %s217_s1, 4  ;;  %s41_s25 = int_to_ptr.vmem [resolvable:$true] %s40_s25 }
   0x9   :  { %43 = dma.hbm_to_vmem [thread:$0]  %s39_s24, 64, %s41_s25, [#allocation6]  }
   0xa   :  { %209 = dma.done.wait [#allocation3], 64  }
   0xb   :  { %210 = vsyncadd [#allocation3], 4294967232 }
   0xc   :  { %211 = dma.done.wait [#allocation6], 128  }
   0xd   :  { %212 = vsyncadd [#allocation6], 4294967168  ;;  %vm63_vm0 = vcmask 1042432   ;;  %vm59_vm1 = vcmask 23552   ;;  %v57_v0 = vld [vmem:[#allocation5] sm:$0x7] }
   0xe   :  { %v56_v1 = vld [vmem:[#allocation2] sm:$0x7]  ;;  %107 = vmatpush.msk.msra.mxu0 %vm63_vm0, %v57_v0  ;;  %v58_v2 = vld [vmem:[#allocation7] sm:$0x7]  ;;  %s218_s0 = smov [#allocation8]   ;;  %s96_s28 = sshll.u32 %s254_s3, 4  ;;  %s97_s28 = int_to_ptr.hbm [resolvable:$true] %s96_s28 }
   0xf   :  { %108 = vmatmul.msk.f32.vlgmr.msra.gmra.mxu0 %vm59_vm1, %v56_v1  ;;  %s94_s2 = sshll.u32 %s218_s0, 4  ;;  %vm87_vm2 = vcmask 18432   ;;  %s95_s2 = int_to_ptr.vmem [resolvable:$true] %s94_s2 }
  0x8c   :  { %v84_v3 = vpop.f32.mrf.mxu0 }
  0x8d   :  { %v85_v4 = vadd.f32 %v84_v3, %v58_v2 }
  0x8f   :  { %88 = vst.msk [vmem:[#allocation8] sm:$0x7] %vm87_vm2, %v85_v4 }
  0x90   :  { %99 = dma.vmem_to_hbm [thread:$0]  %s95_s2, 64, %s97_s28, [#allocation4]  }
  0x91   :  { %213 = dma.done.wait [#allocation4], 64  }
  0x92   :  { %214 = vsyncadd [#allocation4], 4294967232 }
  0x93   :  { %104 = vsyncpa [#allocation3], 1 }
  0x94   :  { %105 = vsyncpa [#allocation6], 1 }
  0x95   :  { %106 = vsyncpa [#allocation4], 1 }

</bundles_post_ra>
